<compile_context>
chip_gen: v6e
topology: v6e:2x2x1
jax: 0.10.0
libtpu: 0.0.40
codegen_flags: <defaults>
</compile_context>

<pallas_src>
from functools import partial

import jax
import jax.numpy as jnp
from jax.experimental import pallas as pl
from jax.experimental.pallas import tpu as pltpu


LANE = 1024                            # lane-dense last dim (multiple of 128)
TARGET_BLOCK_BYTES = 2 * 1024 * 1024   # ~2 MiB per block (portable across chips)


def _lambda_kernel(func, x_ref, o_ref):
    # Whole-tile elementwise application of the wrapped function (VPU/EUP).
    o_ref[...] = func(x_ref[...]).astype(o_ref.dtype)


def _round_up(x, m):
    return ((x + m - 1) // m) * m


def make_lambda(func):
    """JAX/Pallas equivalent of `Lambda(func)` for elementwise `func`."""

    def apply(x):
        orig_shape = x.shape

        # Trace func once to get the output dtype and verify it is
        # shape-preserving (each grid step only sees its own tile).
        out_aval = jax.eval_shape(func, jax.ShapeDtypeStruct(x.shape, x.dtype))
        if out_aval.shape != x.shape:
            raise ValueError(
                "make_lambda only supports elementwise, shape-preserving "
                f"funcs; got {x.shape} -> {out_aval.shape}")
        out_dtype = out_aval.dtype

        n_elem = int(x.size)
        if n_elem == 0:
            return jnp.zeros(orig_shape, out_dtype)

        in_itemsize = jnp.dtype(x.dtype).itemsize
        out_itemsize = jnp.dtype(out_dtype).itemsize

        # Sublane packing factor: 8 rows/vreg for 32-bit, 16 for 16-bit,
        # 32 for 8-bit dtypes (use the narrower of in/out).
        min_itemsize = min(in_itemsize, out_itemsize)
        sub_mult = 8 * max(4 // max(min_itemsize, 1), 1)

        rows = -(-n_elem // LANE)                       # cdiv

        # Target ~2 MiB of the wider-dtype side per block, rounded to the
        # sublane packing factor, capped so we never exceed the data itself.
        bytes_per_row = LANE * max(in_itemsize, out_itemsize)
        block_rows = max(TARGET_BLOCK_BYTES // bytes_per_row, sub_mult)
        block_rows = max((block_rows // sub_mult) * sub_mult, sub_mult)

        if rows >= 2 * sub_mult:
            # Ensure at least 2 grid steps (pipelining + v7x 2-TC sharding).
            block_rows = min(block_rows, _round_up(-(-rows // 2), sub_mult))
        block_rows = max(min(block_rows, _round_up(rows, sub_mult)), sub_mult)

        grid_rows = -(-rows // block_rows)

        # Minimal padding: only up to a multiple of the 1024-lane width.
        # Ragged row counts (rows % block_rows != 0, or rows < block_rows)
        # are handled by Pallas boundary masking on the last grid step.
        padded_elems = rows * LANE
        x_flat = x.reshape(-1)
        if padded_elems != n_elem:
            x_flat = jnp.pad(x_flat, (0, padded_elems - n_elem))
        x2d = x_flat.reshape(rows, LANE)

        # Explicit VMEM budget: 2 in + 2 out buffers per block, with headroom.
        block_in_bytes = block_rows * LANE * in_itemsize
        block_out_bytes = block_rows * LANE * out_itemsize
        vmem_limit_bytes = int(
            min(48 * 1024 * 1024,
                max(32 * 1024 * 1024, 4 * (block_in_bytes + block_out_bytes))))

        kernel = pl.pallas_call(
            partial(_lambda_kernel, func),
            out_shape=jax.ShapeDtypeStruct((rows, LANE), out_dtype),
            grid=(grid_rows,),
            in_specs=[pl.BlockSpec((block_rows, LANE), lambda i: (i, 0))],
            out_specs=pl.BlockSpec((block_rows, LANE), lambda i: (i, 0)),
            compiler_params=pltpu.CompilerParams(
                dimension_semantics=("parallel",),
                vmem_limit_bytes=vmem_limit_bytes,
            ),
        )

        y2d = kernel(x2d)
        y_flat = y2d.reshape(-1)
        if padded_elems != n_elem:
            y_flat = y_flat[:n_elem]
        return y_flat.reshape(orig_shape)

    return apply


if __name__ == "__main__":
    # Deterministic example input, NCHW, small shapes.
    key = jax.random.PRNGKey(0)
    x = jax.random.normal(key, (2, 4, 16, 16), dtype=jnp.float32)

    # The wrapped function for Lambda (elementwise, deterministic).
    func = lambda t: t * 2.0 + 1.0

    lambda_layer = make_lambda(func)
    y = lambda_layer(x)
    jax.block_until_ready(y)

    # Correctness check against the plain-JAX reference of Lambda.forward.
    y_ref = func(x)
    assert y.shape == x.shape and y.dtype == x.dtype
    assert jnp.allclose(y, y_ref, atol=1e-6, rtol=1e-6)

    print("KERNEL_OK")
</pallas_src>

<mosaic_0001>
module attributes {stable_mosaic.version = 11 : i64} {
  func.func @_lambda_kernel(%arg0: i32, %arg1: memref<8x1024xf32, #tpu.memory_space<vmem>>, %arg2: memref<8x1024xf32, #tpu.memory_space<vmem>>) attributes {dimension_semantics = [#tpu.dimension_semantics<parallel>], iteration_bounds = array<i64: 1>, scalar_prefetch = 0 : i64, scratch_operands = 0 : i64, tpu.core_type = #tpu.core_type<tc>, window_params = [{transform_indices = @transform_0, window_bounds = array<i64: 8, 1024>}, {transform_indices = @transform_1, window_bounds = array<i64: 8, 1024>}]} {
    %c0 = arith.constant 0 : index
    %c0_0 = arith.constant 0 : index
    %0 = vector.load %arg1[%c0, %c0_0] : memref<8x1024xf32, #tpu.memory_space<vmem>>, vector<8x1024xf32>
    %cst = arith.constant 2.000000e+00 : f32
    %1 = vector.broadcast %cst : f32 to vector<8x1024xf32>
    %2 = arith.mulf %0, %1 : vector<8x1024xf32>
    %cst_1 = arith.constant 1.000000e+00 : f32
    %3 = vector.broadcast %cst_1 : f32 to vector<8x1024xf32>
    %4 = arith.addf %2, %3 : vector<8x1024xf32>
    %c0_2 = arith.constant 0 : index
    %c0_3 = arith.constant 0 : index
    %5 = vector.load %arg2[%c0_2, %c0_3] : memref<8x1024xf32, #tpu.memory_space<vmem>>, vector<8x1024xf32>
    tpu.vector_store %arg2[%c0_2, %c0_3], %4 {strides = array<i32>} : memref<8x1024xf32, #tpu.memory_space<vmem>>, vector<8x1024xf32>,
    return
  }
  func.func @transform_0(%arg0: i32) -> (i32, i32) {
    %c0_i32 = arith.constant 0 : i32
    %c0_i32_0 = arith.constant 0 : i32
    return %arg0, %c0_i32 : i32, i32
  }
  func.func @transform_1(%arg0: i32) -> (i32, i32) {
    %c0_i32 = arith.constant 0 : i32
    %c0_i32_0 = arith.constant 0 : i32
    return %arg0, %c0_i32 : i32, i32
  }
}

</mosaic_0001>

<bundles_post_ra>
// kernel: tpu_custom_call.1
= control target key start
LH: loop header
LB: loop body
LE: loop exit
PB: predicated region body
PF: predicated region fallthrough
CT: control target
= control target key end

     0   :  { %6 = vsyncpa [#allocation3], 0  ;;  %s146_s0 = inlined_call_operand.hbm [shape: f32[2,1024], index: 0, kind: input, shape index: {}]   ;;  %s147_s1 = inlined_call_operand.hbm [shape: f32[2,1024], index: 1, kind: output, shape index: {}]  }
   0x1   :  { %7 = vsyncpa [#allocation4], 0 }
   0x2   :  { %12 = vsyncadd [#allocation3], 768  ;;  %s120_s6 = smov [#allocation2]  }
   0x3   :  { %s13_s7 = sshll.u32 %s120_s6, 4  ;;  %s14_s7 = int_to_ptr.vmem [resolvable:$true] %s13_s7 }
   0x4   :  { %s84_s8 = scalar_lea.vmem %s14_s7, 256  ;;  %s88_s9 = scalar_lea.vmem %s14_s7, 1024 }
   0x5   :  { %p85_p0 = scmp.ne.s32.totalorder %s14_s7, %s84_s8  ;;  %p89_p1 = scmp.lt.s32.totalorder %s14_s7, %s14_s7 }
   0x6   :  { %p90_p2 = scmp.lt.s32.totalorder %s88_s9, %s84_s8 }
   0x8   :  { %p91_p3 = por %p90_p2, %p89_p1 }
   0xa   :  { %p92_p4 = pnand %p91_p3, %p85_p0 }
   0xc   :  { %95 = shalt.err (!%p92_p4)
}
   0xd   :  { %s121_s10 = smov 256   ;;  %s122_s11 = smov 16  }
   0xe   :  { %19 = dma.hbm_to_vmem [thread:$0]  %s146_s0, 256, %s14_s7, [#allocation3], %s121_s10, %s121_s10, %s122_s11  }
   0xf   :  { %116 = dma.done.wait [#allocation3], 1024  }
  0x10   :  { %117 = vsyncadd [#allocation3], 4294966272  ;;  %v23_v0 = vld [vmem:[#allocation2] sm:$0xff]  ;;  %v24_v1 = vld [vmem:[#allocation2 + $0x8] sm:$0xff] }
  0x11   :  { %v25_v2 = vld [vmem:[#allocation2 + $0x10] sm:$0xff]  ;;  %v31_v3 = vmul.f32 2.0, %v23_v0  ;;  %v32_v4 = vmul.f32 2.0, %v24_v1  ;;  %v26_v6 = vld [vmem:[#allocation2 + $0x18] sm:$0xff]  ;;  %v27_v7 = vld [vmem:[#allocation2 + $0x20] sm:$0xff] }
  0x12   :  { %v33_v5 = vmul.f32 2.0, %v25_v2  ;;  %v28_v8 = vld [vmem:[#allocation2 + $0x28] sm:$0xff]  ;;  %v34_v9 = vmul.f32 2.0, %v26_v6  ;;  %v35_v10 = vmul.f32 2.0, %v27_v7  ;;  %v29_v12 = vld [vmem:[#allocation2 + $0x30] sm:$0xff]  ;;  %v30_v13 = vld [vmem:[#allocation2 + $0x38] sm:$0xff] }
  0x13   :  { %v36_v11 = vmul.f32 2.0, %v28_v8  ;;  %v39_v14 = vadd.f32 1.0, %v31_v3  ;;  %v40_v15 = vadd.f32 1.0, %v32_v4  ;;  %v37_v17 = vmul.f32 2.0, %v29_v12 }
  0x14   :  { %v41_v16 = vadd.f32 1.0, %v33_v5  ;;  %v42_v18 = vadd.f32 1.0, %v34_v9  ;;  %v43_v19 = vadd.f32 1.0, %v35_v10  ;;  %v38_v21 = vmul.f32 2.0, %v30_v13 }
  0x15   :  { %v44_v20 = vadd.f32 1.0, %v36_v11  ;;  %47 = vst [vmem:[#allocation5] sm:$0xff] %v39_v14  ;;  %48 = vst [vmem:[#allocation5 + $0x8] sm:$0xff] %v40_v15  ;;  %v45_v22 = vadd.f32 1.0, %v37_v17 }
  0x16   :  { %49 = vst [vmem:[#allocation5 + $0x10] sm:$0xff] %v41_v16  ;;  %50 = vst [vmem:[#allocation5 + $0x18] sm:$0xff] %v42_v18  ;;  %v46_v23 = vadd.f32 1.0, %v38_v21 }
  0x17   :  { %51 = vst [vmem:[#allocation5 + $0x20] sm:$0xff] %v43_v19  ;;  %52 = vst [vmem:[#allocation5 + $0x28] sm:$0xff] %v44_v20 }
  0x18   :  { %53 = vst [vmem:[#allocation5 + $0x30] sm:$0xff] %v45_v22  ;;  %54 = vst [vmem:[#allocation5 + $0x38] sm:$0xff] %v46_v23 }
  0x19   :  { %59 = vsyncadd [#allocation4], 768  ;;  %s123_s0 = smov [#allocation5]  }
  0x1a   :  { %s60_s14 = sshll.u32 %s123_s0, 4  ;;  %s61_s14 = int_to_ptr.vmem [resolvable:$true] %s60_s14 }
  0x1b   :  { %s96_s15 = scalar_lea.vmem %s61_s14, 256  ;;  %s100_s16 = scalar_lea.vmem %s61_s14, 1024 }
  0x1c   :  { %p97_p5 = scmp.ne.s32.totalorder %s61_s14, %s96_s15  ;;  %p101_p6 = scmp.lt.s32.totalorder %s61_s14, %s61_s14 }
  0x1d   :  { %p102_p7 = scmp.lt.s32.totalorder %s100_s16, %s96_s15 }
  0x1f   :  { %p103_p8 = por %p102_p7, %p101_p6 }
  0x21   :  { %p104_p9 = pnand %p103_p8, %p97_p5 }
  0x23   :  { %107 = shalt.err (!%p104_p9)
}
  0x24   :  { %66 = dma.vmem_to_hbm [thread:$0]  %s61_s14, 256, %s147_s1, [#allocation4], %s121_s10, %s121_s10, %s122_s11  }
  0x25   :  { %118 = dma.done.wait [#allocation4], 1024  }
  0x26   :  { %119 = vsyncadd [#allocation4], 4294966272 }
  0x27   :  { %70 = vsyncpa [#allocation3], 1 }
  0x28   :  { %71 = vsyncpa [#allocation4], 1 }

</bundles_post_ra>
